<compile_context>
chip_gen: v5e
topology: v5e:2x2
jax: 0.10.0
libtpu: 0.0.40
codegen_flags: <defaults>
</compile_context>

<pallas_src>
import functools

import jax
import jax.numpy as jnp
import numpy as np
from jax import lax
from jax.experimental import pallas as pl
from jax.experimental.pallas import tpu as pltpu

_EPS = 1e-12            # F.normalize default eps
_EPS_SQ = _EPS * _EPS   # max(||v||, eps) == sqrt(max(sum(v^2), eps^2))

_VMEM_TILE_BUDGET = 40 * 1024 * 1024   # leaves headroom under v7x's 64 MiB VMEM
_VMEM_LIMIT_BYTES = 56 * 1024 * 1024   # explicit scoped-VMEM limit (v5e..v7x safe)


def _norm_classifier_kernel(x_ref, w_ref, o_ref, *, precision):
    """One (tm x tn) tile of cosine-similarity logits.

    x_ref : [tm, K]  batch-row tile (native dtype)
    w_ref : [tn, K]  class-weight tile (native dtype)
    o_ref : [tm, tn] logits tile
    """
    x = x_ref[...]
    w = w_ref[...]

    # Row-wise inverse L2 norms (f32 accumulation, EUP rsqrt).
    xf = x.astype(jnp.float32)
    wf = w.astype(jnp.float32)
    inv_x = lax.rsqrt(
        jnp.maximum(jnp.sum(xf * xf, axis=-1, keepdims=True), _EPS_SQ))  # [tm, 1]
    inv_w = lax.rsqrt(
        jnp.maximum(jnp.sum(wf * wf, axis=-1), _EPS_SQ))                 # [tn]

    # Matmul in the NATIVE dtype on the MXU with an f32 accumulator; apply the
    # normalization as an output scaling (identical to normalize-then-matmul).
    acc = lax.dot_general(
        x, w,
        dimension_numbers=(((1,), (1,)), ((), ())),
        preferred_element_type=jnp.float32,
        precision=precision,
    )
    o_ref[...] = (acc * inv_x * inv_w[None, :]).astype(o_ref.dtype)


def _vmem_tile_bytes(tm, tn, K, in_itemsize, out_itemsize):
    # Double-buffered input blocks + double-buffered output block.
    return 2 * (tm + tn) * K * in_itemsize + 2 * tm * tn * out_itemsize


def _choose_tiles(M, N, K, in_itemsize, out_itemsize):
    """Largest (8,128)-legal tiles that fit the VMEM budget; K stays whole."""
    # 256-aligned preferred (v6e/v7x MXU is 256 wide); wide class tile first
    # because class weights stream while the batch tile stays resident.
    for pm, pn in ((256, 512), (256, 256), (128, 256), (128, 128),
                   (64, 128), (32, 128), (16, 128), (8, 128)):
        tm = M if M <= pm else pm      # full extent or a multiple of 8
        tn = N if N <= pn else pn      # full extent or a multiple of 128
        if _vmem_tile_bytes(tm, tn, K, in_itemsize, out_itemsize) <= _VMEM_TILE_BUDGET:
            return tm, tn
    # TODO(synk): for extreme feature dims the K axis should also be tiled with
    # an f32 accumulator; not needed for typical classifier feature sizes.
    return (M if M <= 8 else 8), (N if N <= 128 else 128)


def normalized_classifier(x, weight):
    """JAX/Pallas equivalent of NormalizedClassifier(...).forward(x)."""
    M, K = x.shape
    N, K2 = weight.shape
    assert K == K2, (x.shape, weight.shape)
    assert x.dtype == weight.dtype, (x.dtype, weight.dtype)

    out_dtype = x.dtype
    in_itemsize = jnp.dtype(x.dtype).itemsize
    out_itemsize = jnp.dtype(out_dtype).itemsize

    tm, tn = _choose_tiles(M, N, K, in_itemsize, out_itemsize)
    grid_m = pl.cdiv(M, tm)
    grid_n = pl.cdiv(N, tn)

    # Full-precision MXU passes for f32 inputs (PyTorch fidelity); native fast
    # path for bf16/fp16 inputs.
    precision = (lax.Precision.HIGHEST
                 if jnp.dtype(x.dtype) == jnp.float32 else None)

    # x block index is constant across the innermost (j) axis -> x is DMA'd once
    # per batch tile; the class weights are re-streamed once per batch tile.
    cost = pl.CostEstimate(
        flops=2 * M * N * K + 2 * K * (M * grid_n + N * grid_m) + 2 * M * N,
        transcendentals=M * grid_n + N * grid_m,
        bytes_accessed=(M * K * in_itemsize
                        + grid_m * N * K * in_itemsize
                        + M * N * out_itemsize),
    )

    kernel = functools.partial(_norm_classifier_kernel, precision=precision)

    return pl.pallas_call(
        kernel,
        out_shape=jax.ShapeDtypeStruct((M, N), out_dtype),
        grid_spec=pltpu.PrefetchScalarGridSpec(
            num_scalar_prefetch=0,
            grid=(grid_m, grid_n),
            in_specs=[
                pl.BlockSpec((tm, K), lambda i, j: (i, 0)),
                pl.BlockSpec((tn, K), lambda i, j: (j, 0)),
            ],
            out_specs=pl.BlockSpec((tm, tn), lambda i, j: (i, j)),
        ),
        compiler_params=pltpu.CompilerParams(
            dimension_semantics=("parallel", "parallel"),
            vmem_limit_bytes=_VMEM_LIMIT_BYTES,
        ),
        cost_estimate=cost,
    )(x, weight)


def _normalized_classifier_ref(x, weight):
    """Float64 NumPy reference mirroring the PyTorch forward line by line."""
    x = np.asarray(x, np.float64)
    w = np.asarray(weight, np.float64)
    xn = x / np.maximum(np.linalg.norm(x, axis=1, keepdims=True), _EPS)
    wn = w / np.maximum(np.linalg.norm(w, axis=1, keepdims=True), _EPS)
    return xn @ wn.T


if __name__ == "__main__":
    key = jax.random.PRNGKey(0)
    k1, k2, k3, k4 = jax.random.split(key, 4)

    # --- small shapes implied by the module: batch=2, feature_dim=32, classes=16
    B, D, C = 2, 32, 16
    x = jax.random.normal(k1, (B, D), jnp.float32)
    # Mimic the module init spirit (uniform(-1,1), renormed then scaled);
    # forward is init-agnostic.
    w = jax.random.uniform(k2, (C, D), jnp.float32, minval=-1.0, maxval=1.0) * 100.0

    out = jax.block_until_ready(normalized_classifier(x, w))
    ref = _normalized_classifier_ref(x, w)
    assert out.shape == (B, C), out.shape
    err = float(np.max(np.abs(np.asarray(out, np.float64) - ref)))
    assert err < 1e-3, err

    # --- tiled path with ragged edge blocks on both grid axes (grid = (2, 2))
    B2, D2, C2 = 300, 384, 640
    x2 = jax.random.normal(k3, (B2, D2), jnp.float32)
    w2 = jax.random.normal(k4, (C2, D2), jnp.float32)
    out2 = jax.block_until_ready(normalized_classifier(x2, w2))
    ref2 = _normalized_classifier_ref(x2, w2)
    assert out2.shape == (B2, C2), out2.shape
    err2 = float(np.max(np.abs(np.asarray(out2, np.float64) - ref2)))
    assert err2 < 1e-3, err2

    print("KERNEL_OK")
</pallas_src>

<mosaic_0001>
module attributes {stable_mosaic.version = 11 : i64} {
  func.func @_norm_classifier_kernel(%arg0: i32, %arg1: i32, %arg2: memref<2x32xf32, #tpu.memory_space<vmem>>, %arg3: memref<16x32xf32, #tpu.memory_space<vmem>>, %arg4: memref<2x16xf32, #tpu.memory_space<vmem>>) attributes {dimension_semantics = [#tpu.dimension_semantics<parallel>, #tpu.dimension_semantics<parallel>], iteration_bounds = array<i64: 1, 1>, scalar_prefetch = 0 : i64, scratch_operands = 0 : i64, tpu.core_type = #tpu.core_type<tc>, window_params = [{transform_indices = @transform_0, window_bounds = array<i64: 2, 32>}, {transform_indices = @transform_1, window_bounds = array<i64: 16, 32>}, {transform_indices = @transform_2, window_bounds = array<i64: 2, 16>}]} {
    %c0 = arith.constant 0 : index
    %c0_0 = arith.constant 0 : index
    %0 = vector.load %arg2[%c0, %c0_0] : memref<2x32xf32, #tpu.memory_space<vmem>>, vector<2x32xf32>
    %c0_1 = arith.constant 0 : index
    %c0_2 = arith.constant 0 : index
    %1 = vector.load %arg3[%c0_1, %c0_2] : memref<16x32xf32, #tpu.memory_space<vmem>>, vector<16x32xf32>
    %2 = arith.mulf %0, %0 : vector<2x32xf32>
    %cst = arith.constant dense<0.000000e+00> : vector<2xf32>
    %3 = vector.multi_reduction <add>, %2, %cst [1] : vector<2x32xf32> to vector<2xf32>
    %4 = vector.shape_cast %3 : vector<2xf32> to vector<2x1xf32>
    %cst_3 = arith.constant 1.000000e-24 : f32
    %5 = vector.broadcast %cst_3 : f32 to vector<2x1xf32>
    %6 = arith.maximumf %4, %5 : vector<2x1xf32>
    %7 = math.rsqrt %6 : vector<2x1xf32>
    %8 = arith.mulf %1, %1 : vector<16x32xf32>
    %cst_4 = arith.constant dense<0.000000e+00> : vector<16xf32>
    %9 = vector.multi_reduction <add>, %8, %cst_4 [1] : vector<16x32xf32> to vector<16xf32>
    %cst_5 = arith.constant 1.000000e-24 : f32
    %10 = vector.broadcast %cst_5 : f32 to vector<16xf32>
    %11 = arith.maximumf %9, %10 : vector<16xf32>
    %12 = math.rsqrt %11 : vector<16xf32>
    %cst_6 = arith.constant dense<0.000000e+00> : vector<2x16xf32>
    %13 = tpu.matmul %0, %1, %cst_6 {dimension_numbers = #tpu.dot_dimension_numbers<[1], [1], [0], [0], [0, 0, 1, 0], [], []>, precision = #tpu.contract_precision<fp32>} : vector<2x32xf32>, vector<16x32xf32>, vector<2x16xf32> -> vector<2x16xf32>
    %14 = vector.broadcast %7 : vector<2x1xf32> to vector<2x16xf32>
    %15 = arith.mulf %13, %14 : vector<2x16xf32>
    %16 = vector.shape_cast %12 : vector<16xf32> to vector<1x16xf32>
    %17 = vector.broadcast %16 : vector<1x16xf32> to vector<2x16xf32>
    %18 = arith.mulf %15, %17 : vector<2x16xf32>
    %c0_7 = arith.constant 0 : index
    %c0_8 = arith.constant 0 : index
    %19 = vector.load %arg4[%c0_7, %c0_8] : memref<2x16xf32, #tpu.memory_space<vmem>>, vector<2x16xf32>
    tpu.vector_store %arg4[%c0_7, %c0_8], %18 {strides = array<i32>} : memref<2x16xf32, #tpu.memory_space<vmem>>, vector<2x16xf32>,
    return
  }
  func.func @transform_0(%arg0: i32, %arg1: i32) -> (i32, i32) {
    %c0_i32 = arith.constant 0 : i32
    %c0_i32_0 = arith.constant 0 : i32
    return %arg0, %c0_i32 : i32, i32
  }
  func.func @transform_1(%arg0: i32, %arg1: i32) -> (i32, i32) {
    %c0_i32 = arith.constant 0 : i32
    %c0_i32_0 = arith.constant 0 : i32
    return %arg1, %c0_i32 : i32, i32
  }
  func.func @transform_2(%arg0: i32, %arg1: i32) -> (i32, i32) {
    %c0_i32 = arith.constant 0 : i32
    return %arg0, %arg1 : i32, i32
  }
}

</mosaic_0001>

<bundles_post_ra>
// kernel: tpu_custom_call.1
= control target key start
LH: loop header
LB: loop body
LE: loop exit
PB: predicated region body
PF: predicated region fallthrough
CT: control target
= control target key end

     0   :  { %7 = vsyncpa [#allocation3], 0  ;;  %s415_s0 = inlined_call_operand.hbm [shape: f32[2,32], index: 0, kind: input, shape index: {}]   ;;  %s416_s1 = inlined_call_operand.hbm [shape: f32[16,32], index: 1, kind: input, shape index: {}]   ;;  %s417_s2 = inlined_call_operand.hbm [shape: f32[2,16], index: 2, kind: output, shape index: {}]  }
   0x1   :  { %8 = vsyncpa [#allocation6], 0 }
   0x2   :  { %9 = vsyncpa [#allocation4], 0  ;;  %s15_s11 = sshll.u32 %s415_s0, 4  ;;  %s381_s12 = smov [#allocation2]   ;;  %s16_s11 = int_to_ptr.hbm [resolvable:$true] %s15_s11 }
   0x3   :  { %s17_s13 = sshll.u32 %s381_s12, 4  ;;  %s25_s16 = sshll.u32 %s416_s1, 4  ;;  %s18_s13 = int_to_ptr.vmem [resolvable:$true] %s17_s13  ;;  %s26_s16 = int_to_ptr.hbm [resolvable:$true] %s25_s16 }
   0x4   :  { %20 = dma.hbm_to_vmem [thread:$0]  %s16_s11, 32, %s18_s13, [#allocation3]  }
   0x5   :  { %s382_s17 = smov [#allocation5]   ;;  %s383_s19 = smov 128  }
   0x6   :  { %s27_s18 = sshll.u32 %s382_s17, 4  ;;  %s384_s20 = smov 8   ;;  %s28_s18 = int_to_ptr.vmem [resolvable:$true] %s27_s18 }
   0x7   :  { %33 = dma.hbm_to_vmem [thread:$0]  %s26_s16, 256, %s28_s18, [#allocation6], %s383_s19, %s383_s19, %s384_s20  }
   0x8   :  { %375 = dma.done.wait [#allocation3], 32  }
   0x9   :  { %376 = vsyncadd [#allocation3], 4294967264 }
   0xa   :  { %377 = dma.done.wait [#allocation6], 256  }
   0xb   :  { %378 = vsyncadd [#allocation6], 4294967040  ;;  %vm63_vm0 = vcmask 261120   ;;  %v43_v0 = vld [vmem:[#allocation5] sm:$0xff]  ;;  %v42_v1 = vld [vmem:[#allocation2] sm:$0x3]  ;;  %v263_v45 = vlaneseq }
   0xc   :  { %vm46_vm1 = vcmask 254976   ;;  %v44_v2 = vld [vmem:[#allocation5 + $0x8] sm:$0xff]  ;;  %v61_v3 = vmul.f32 %v43_v0, %v43_v0  ;;  %v96_v4 = vsel %vm63_vm0, %v43_v0, 0  ;;  %v45_v5 = vmul.f32 %v42_v1, %v42_v1  ;;  %s385_s0 = smov [#allocation7]   ;;  %s281_s23 = sshll.u32 %s417_s2, 4  ;;  %s282_s23 = int_to_ptr.hbm [resolvable:$true] %s281_s23 }
   0xd   :  { %v93_v6 = vsel %vm63_vm0, %v42_v1, 0  ;;  %v117_v7 = vand.u32 4294901760, %v96_v4  ;;  %v99_v9 = vsel %vm63_vm0, %v44_v2, 0  ;;  %v62_v16 = vmul.f32 %v44_v2, %v44_v2  ;;  %s279_s1 = sshll.u32 %s385_s0, 4  ;;  %s280_s1 = int_to_ptr.vmem [resolvable:$true] %s279_s1 }
   0xe   :  { %v119_v8 = vand.u32 4294901760, %v93_v6  ;;  %v64_v10 = vsel %vm63_vm0, %v61_v3, 0.0  ;;  %v47_v11 = vsel %vm46_vm1, %v45_v5, 0.0  ;;  %v115_v12 = vand.u32 4294901760, %v99_v9 }
   0xf   :  { %65 = vadd.xlane.f32.xlu0 %v64_v10  ;;  %48 = vadd.xlane.f32.xlu1 %v47_v11  ;;  %v149_v13 = vsub.f32 %v96_v4, %v117_v7  ;;  %v67_v22 = vsel %vm63_vm0, %v62_v16, 0.0  ;;  %v264_v53 = vand.u32 127, %v263_v45  ;;  %vm268_vm11 = vcmask 130112  }
  0x10   :  { %v120_v14 = vsub.f32 %v93_v6, %v119_v8  ;;  %v143_v15 = vsub.f32 %v99_v9, %v115_v12  ;;  %116 = vmatpush.xpose.msra.mxu0 %v115_v12  ;;  %200 = vmatpush.xpose.msra.mxu3 %v115_v12  ;;  %vm272_vm12 = vcmask 123904  }
  0x11   :  { %v150_v17 = vand.u32 4294901760, %v149_v13  ;;  %v266_v58 = vadd.s32 4294967288, %v264_v53 }
  0x12   :  { %v121_v18 = vand.u32 4294901760, %v120_v14  ;;  %175 = vmatpush.xpose.msra.mxu2 %v143_v15  ;;  %v144_v19 = vand.u32 4294901760, %v143_v15 }
  0x13   :  { %v151_v23 = vsub.f32 %v149_v13, %v150_v17 }
  0x14   :  { %v122_v20 = vsub.f32 %v120_v14, %v121_v18  ;;  %v145_v21 = vsub.f32 %v143_v15, %v144_v19  ;;  %118 = vmatpush.xpose.msra.mxu0 %v117_v7  ;;  %202 = vmatpush.xpose.msra.mxu3 %v117_v7 }
  0x15   :  { %v152_v26 = vand.u32 4294901760, %v151_v23 }
  0x16   :  { %v123_v24 = vand.u32 4294901760, %v122_v20  ;;  %v146_v25 = vand.u32 4294901760, %v145_v21  ;;  %178 = vmatpush.xpose.msra.mxu2 %v149_v13 }
  0x17   :  { %68 = vadd.xlane.f32.xlu0 %v67_v22  ;;  %206 = vmatmul.f32.vlgmr.msra.gmra.mxu3 %v121_v18 }
  0x18   :  { %227 = vmatpush.xpose.msrb.mxu0 %v144_v19  ;;  %147 = vmatpush.xpose.msra.mxu1 %v146_v25 }
  0x19   :  { %124 = vmatmul.f32.vlgmr.msra.gmra.mxu0 %v123_v24  ;;  %181 = vmatmul.f32.vlgmr.msra.gmra.mxu2 %v120_v14 }
  0x1c   :  { %231 = vmatpush.xpose.msrb.mxu0 %v150_v17  ;;  %153 = vmatpush.xpose.msra.mxu1 %v152_v26 }
  0x1f   :  { %155 = vmatmul.f32.vlgmr.msra.gmra.mxu1 %v119_v8 }
  0x20   :  { %252 = vmatpush.xpose.msrb.mxu1 %v115_v12 }
  0x21   :  { %233 = vmatmul.f32.vlgmr.msrb.gmra.mxu0 %v119_v8 }
  0x24   :  { %254 = vmatpush.xpose.msrb.mxu1 %v117_v7 }
  0x27   :  { %256 = vmatmul.f32.vlgmr.msrb.gmra.mxu1 %v119_v8 }
  0x82   :  { %v66_v27 = vpop.xlane.xlu0 %65  ;;  %v49_v28 = vpop.xlane.xlu1 %48 }
  0x83   :  { %v70_v29 = vmax.f32 %v66_v27, 1e-24  ;;  %v50_v30 = vmax.f32 %v49_v28, 1e-24 }
  0x85   :  { %297 = vrsqrt.f32 %v70_v29  ;;  %vm78_vm4 = vweird.f32 %v70_v29  ;;  %vm57_vm6 = vweird.f32 %v50_v30 }
  0x86   :  { %299 = vrsqrt.f32 %v50_v30 }
  0x8a   :  { %v69_v31 = vpop.xlane.xlu0 %68 }
  0x8b   :  { %v71_v32 = vmax.f32 %v69_v31, 1e-24  ;;  %v298_v33 = vpop.eup %297 }
  0x8c   :  { %v300_v34 = vpop.eup %299  ;;  %v73_v35 = vmul.f32 %v298_v33, %v70_v29  ;;  %vm79_vm5 = vweird.f32 %v298_v33 }
  0x8d   :  { %301 = vrsqrt.f32 %v71_v32  ;;  %v52_v36 = vmul.f32 %v300_v34, %v50_v30  ;;  %vm88_vm2 = vweird.f32 %v71_v32  ;;  %vm58_vm7 = vweird.f32 %v300_v34  ;;  %vm80_vm9 = vmor %vm78_vm4, %vm79_vm5 }
  0x8e   :  { %v74_v38 = vmul.f32 %v298_v33, %v73_v35  ;;  %vm59_vm10 = vmor %vm57_vm6, %vm58_vm7 }
  0x8f   :  { %v53_v40 = vmul.f32 %v300_v34, %v52_v36 }
  0x90   :  { %v75_v43 = vmul.f32 0.5, %v74_v38 }
  0x91   :  { %v54_v46 = vmul.f32 0.5, %v53_v40 }
  0x92   :  { %v76_v48 = vsub.f32 1.5, %v75_v43 }
  0x93   :  { %v302_v37 = vpop.eup %301  ;;  %v55_v54 = vsub.f32 1.5, %v54_v46 }
  0x94   :  { %v83_v39 = vmul.f32 %v302_v37, %v71_v32  ;;  %vm89_vm3 = vweird.f32 %v302_v37  ;;  %v77_v56 = vmul.f32 %v298_v33, %v76_v48 }
  0x95   :  { %vm90_vm8 = vmor %vm88_vm2, %vm89_vm3  ;;  %v56_v62 = vmul.f32 %v300_v34, %v55_v54 }
  0x96   :  { %v84_v41 = vmul.f32 %v302_v37, %v83_v39  ;;  %v125_v42 = vpop.f32.mrf.mxu0  ;;  %v81_v63 = vsel %vm80_vm9, %v298_v33, %v77_v56 }
  0x97   :  { %v265_v4 = vperm.slane %v81_v63, %v264_v53  ;;  %v60_v5 = vsel %vm59_vm10, %v300_v34, %v56_v62 }
  0x98   :  { %v85_v44 = vmul.f32 0.5, %v84_v41 }
  0x9a   :  { %v86_v47 = vsub.f32 1.5, %v85_v44  ;;  %v207_v55 = vpop.f32.mrf.mxu3 }
  0x9c   :  { %v156_v49 = vpop.f32.mrf.mxu1  ;;  %v182_v50 = vpop.f32.mrf.mxu2  ;;  %v87_v51 = vmul.f32 %v302_v37, %v86_v47 }
  0x9d   :  { %v157_v52 = vadd.f32 %v156_v49, %v125_v42 }
  0x9e   :  { %v234_v59 = vpop.f32.mrf.mxu0  ;;  %v91_v60 = vsel %vm90_vm8, %v302_v37, %v87_v51 }
  0x9f   :  { %v183_v57 = vadd.f32 %v182_v50, %v157_v52  ;;  %v267_v1 = vperm.slane %v91_v60, %v266_v58 }
  0xa1   :  { %v208_v61 = vadd.f32 %v207_v55, %v183_v57  ;;  %v269_v7 = vsel %vm268_vm11, %v267_v1, %v265_v4 }
  0xa3   :  { %v235_v0 = vadd.f32 %v234_v59, %v208_v61 }
  0xa4   :  { %v257_v2 = vpop.f32.mrf.mxu1 }
  0xa5   :  { %v258_v3 = vadd.f32 %v257_v2, %v235_v0 }
  0xa7   :  { %v260_v6 = vmul.f32 %v258_v3, %v60_v5 }
  0xa9   :  { %v271_v8 = vmul.f32 %v269_v7, %v260_v6 }
  0xab   :  { %273 = vst.msk [vmem:[#allocation7] sm:$0x3] %vm272_vm12, %v271_v8 }
  0xac   :  { %284 = dma.vmem_to_hbm [thread:$0]  %s280_s1, 32, %s282_s23, [#allocation4]  }
  0xad   :  { %379 = dma.done.wait [#allocation4], 32  }
  0xae   :  { %380 = vsyncadd [#allocation4], 4294967264 }
  0xaf   :  { %289 = vsyncpa [#allocation3], 1 }
  0xb0   :  { %290 = vsyncpa [#allocation6], 1 }
  0xb1   :  { %291 = vsyncpa [#allocation4], 1 }

</bundles_post_ra>
